<compile_context>
chip_gen: v7x
topology: tpu7x:2x2x1
jax: 0.10.0
libtpu: 0.0.40
codegen_flags: <defaults>
</compile_context>

<pallas_src>
import functools

import jax
import jax.numpy as jnp
from jax.experimental import pallas as pl
from jax.experimental.pallas import tpu as pltpu


def _round_up(x, m):
    return ((x + m - 1) // m) * m


# ----------------------------------------------------------------------------
# Fused StackCNN kernel: layer_num x (conv1d k,s=1,p=0 + ReLU) then max-pool.
# ----------------------------------------------------------------------------
def _stackcnn_kernel(x_ref, w_ref, b_ref, o_ref, *, layer_num, ksize, bt, lp,
                     length):
    """One batch tile, fully VMEM/vreg resident.

    x_ref : [bt*lp, Cp]                bf16, rows = batch-major flattened (b, l)
    w_ref : [layer_num, ksize*Cp, Cp]  bf16, taps folded into contraction dim
    b_ref : [layer_num, 1, Cp]         fp32
    o_ref : [1, bt, Cp]                fp32, per-sequence channel max

    Validity invariant: before layer li, rows [lv_li, lp) of every lp-row
    batch block are garbage (zero padding, shift spill, or cross-batch rows
    pulled in by the row shift).  Each layer shrinks the valid range by
    (ksize-1) rows, which is exactly how far the garbage can creep inward, and
    the final pool only reads rows [0, lv_final).  Any change to lp rounding,
    the pool range, or padding>0 support must preserve this invariant.
    """
    rows = bt * lp
    cp = b_ref.shape[-1]
    h = x_ref[...]                                   # bf16 [rows, Cp]
    lv = length
    y = None
    for li in range(layer_num):
        # Tap-folded LHS: lhs[:, j*Cp:(j+1)*Cp] = h shifted up by j rows.
        # Shifted copies are bf16 (half the bytes of the old fp32 output
        # shifts).  A sublane pltpu.roll would land these on the XLU slot, but
        # rolling packed bf16 by odd row counts is lowering-fragile, so the
        # plain slice+concat (guaranteed to compile) is kept here.
        parts = [h]
        for j in range(1, ksize):
            parts.append(jnp.concatenate(
                [h[j:, :], jnp.zeros((j, cp), h.dtype)], axis=0))
        lhs = jnp.concatenate(parts, axis=-1)        # bf16 [rows, ksize*Cp]
        # One MXU matmul per layer (K = ksize*Cp), fp32 accumulation in the
        # MXU; bias + ReLU is the only per-layer VPU epilogue.
        y = jnp.maximum(
            jnp.dot(lhs, w_ref[li], preferred_element_type=jnp.float32)
            + b_ref[li], 0.0)                        # fp32 [rows, Cp]
        lv -= ksize - 1
        if li + 1 < layer_num:
            h = y.astype(jnp.bfloat16)               # bf16 inter-layer storage
    # AdaptiveMaxPool1d(1): single masked reduction over valid positions.
    h3 = y.reshape(bt, lp, cp)                       # layout-preserving split
    row_idx = jax.lax.broadcasted_iota(jnp.int32, (lp, cp), 0)
    valid = (row_idx < lv)[None, :, :]               # lv is compile-time const
    pooled = jnp.max(jnp.where(valid, h3, -jnp.inf), axis=1)   # [bt, Cp] fp32
    o_ref[...] = pooled[None, :, :].astype(o_ref.dtype)


# ----------------------------------------------------------------------------
# Module builder (mirrors StackCNN(layer_num, in_channels, out_channels, k)).
# ----------------------------------------------------------------------------
def make_stack_cnn(layer_num, in_channels, out_channels, kernel_size):
    assert layer_num >= 1
    cp = max(_round_up(in_channels, 128), _round_up(out_channels, 128))

    def init_fn(key):
        # PyTorch Conv1d default init: U(-1/sqrt(fan_in), 1/sqrt(fan_in)),
        # fan_in = cin * kernel_size.  Weights are padded to the 128-lane
        # width, tap-folded to [ksize*Cp, Cp] per layer and cast to bf16 ONCE.
        w = jnp.zeros((layer_num, kernel_size * cp, cp), jnp.float32)
        b = jnp.zeros((layer_num, 1, cp), jnp.float32)
        keys = jax.random.split(key, 2 * layer_num)
        for li in range(layer_num):
            cin = in_channels if li == 0 else out_channels
            bound = 1.0 / float(cin * kernel_size) ** 0.5
            wl = jax.random.uniform(keys[2 * li],
                                    (out_channels, cin, kernel_size),
                                    jnp.float32, -bound, bound)
            bl = jax.random.uniform(keys[2 * li + 1], (out_channels,),
                                    jnp.float32, -bound, bound)
            wt = jnp.transpose(wl, (2, 1, 0))        # [K, cin, cout]
            for j in range(kernel_size):
                w = w.at[li, j * cp:j * cp + cin, :out_channels].set(wt[j])
            b = b.at[li, 0, :out_channels].set(bl)
        return {"w": w.astype(jnp.bfloat16), "b": b}

    def apply_fn(params, x):
        """x: [B, C_in, L] (PyTorch NCL).  Returns [B, C_out]."""
        batch, cin, length = x.shape
        assert cin == in_channels
        # TODO(synk): IMAEN always builds StackCNN with padding=0; padding>0
        # variants would zero-pad L here in the wrapper (and the validity
        # invariant / pool range in the kernel must be updated accordingly).
        l_final = length - layer_num * (kernel_size - 1)
        assert l_final >= 1, "sequence too short for this conv stack"
        lp = _round_up(length, 16)                   # bf16 sublane packing

        # Batch tile: at least 2 grid steps when batch >= 2 (v7x megacore),
        # capped by a per-step VMEM activation budget (v7x physical = 64 MiB).
        bt = min(batch, 8)
        if batch >= 2:
            bt = min(bt, (batch + 1) // 2)
        per_row_bytes = cp * (2 * kernel_size + 10)  # lhs(bf16)+y(f32)+h+x dbuf
        while bt > 1 and bt * lp * per_row_bytes > (8 << 20):
            bt //= 2
        bp = _round_up(batch, bt)
        n_steps = bp // bt

        # Single fused transpose + pad + reshape; input fed as bf16 so the
        # per-grid-step DMA and the double-buffered input VMEM are halved.
        x_nlc = jnp.transpose(x, (0, 2, 1)).astype(jnp.bfloat16)
        x_flat = jnp.pad(
            x_nlc, ((0, bp - batch), (0, lp - length), (0, cp - cin))
        ).reshape(bp * lp, cp)

        out = pl.pallas_call(
            functools.partial(_stackcnn_kernel, layer_num=layer_num,
                              ksize=kernel_size, bt=bt, lp=lp, length=length),
            out_shape=jax.ShapeDtypeStruct((n_steps, bt, cp), jnp.float32),
            grid_spec=pltpu.PrefetchScalarGridSpec(
                num_scalar_prefetch=0,
                grid=(n_steps,),
                in_specs=[
                    pl.BlockSpec((bt * lp, cp), lambda i: (i, 0)),
                    # Constant-index weight/bias blocks (pl.Buffered(1) would
                    # shave ~300 KiB of VMEM but is skipped for lowering
                    # safety; Mosaic sees the constant index_map).
                    pl.BlockSpec((layer_num, kernel_size * cp, cp),
                                 lambda i: (0, 0, 0)),
                    pl.BlockSpec((layer_num, 1, cp), lambda i: (0, 0, 0)),
                ],
                out_specs=pl.BlockSpec((1, bt, cp), lambda i: (i, 0, 0)),
            ),
            compiler_params=pltpu.CompilerParams(
                dimension_semantics=("parallel",),
                vmem_limit_bytes=48 * 1024 * 1024),
        )(x_flat, params["w"], params["b"])
        return out.reshape(bp, cp)[:batch, :out_channels]

    return init_fn, apply_fn


# ----------------------------------------------------------------------------
# Pure-JAX reference (PyTorch Conv1d semantics) for correctness validation.
# ----------------------------------------------------------------------------
def _stackcnn_reference(params, x, *, layer_num, in_channels, out_channels,
                        kernel_size):
    cp = params["w"].shape[-1]
    h = x.astype(jnp.float32)
    for li in range(layer_num):
        cin = in_channels if li == 0 else out_channels
        wl = params["w"][li].astype(jnp.float32)     # [K*Cp, Cp] tap-folded
        bias = params["b"][li, 0, :out_channels]
        lout = h.shape[2] - kernel_size + 1
        out = jnp.zeros((h.shape[0], out_channels, lout), jnp.float32)
        out = out + bias[None, :, None]
        for j in range(kernel_size):
            wj = wl[j * cp:j * cp + cin, :out_channels]   # [cin, cout]
            out = out + jnp.einsum('bcl,co->bol', h[:, :, j:j + lout], wj)
        h = jnp.maximum(out, 0.0)
    return jnp.max(h, axis=2)      # AdaptiveMaxPool1d(1).squeeze(-1)


# ----------------------------------------------------------------------------
# Main
# ----------------------------------------------------------------------------
if __name__ == "__main__":
    key = jax.random.PRNGKey(0)
    kp, kx = jax.random.split(key)

    # Small shapes consistent with IMAEN's protein encoder usage:
    #   StackCNN(layer_num=3, in_channels=embed_dim=128, out_channels=96, k=3)
    layer_num, in_ch, out_ch, ksize = 3, 128, 96, 3
    batch, length = 2, 32

    init_fn, apply_fn = make_stack_cnn(layer_num, in_ch, out_ch, ksize)
    params = init_fn(kp)
    x = jax.random.normal(kx, (batch, in_ch, length), jnp.float32)

    fwd = jax.jit(apply_fn)
    out = jax.block_until_ready(fwd(params, x))
    assert out.shape == (batch, out_ch)
    assert bool(jnp.all(jnp.isfinite(out)))

    ref = _stackcnn_reference(params, x, layer_num=layer_num,
                              in_channels=in_ch, out_channels=out_ch,
                              kernel_size=ksize)
    max_err = float(jnp.max(jnp.abs(out - ref)))
    # bf16 weights/activations vs fp32 reference -> ~1e-2-scale error expected.
    assert bool(jnp.allclose(out, ref, atol=5e-2, rtol=5e-2)), max_err

    print("KERNEL_OK")
</pallas_src>

<mosaic_0001>
module attributes {stable_mosaic.version = 11 : i64} {
  func.func @_stackcnn_kernel(%arg0: i32, %arg1: memref<32x128xbf16, #tpu.memory_space<vmem>>, %arg2: memref<3x384x128xbf16, #tpu.memory_space<vmem>>, %arg3: memref<3x1x128xf32, #tpu.memory_space<vmem>>, %arg4: memref<1x1x128xf32, #tpu.memory_space<vmem>>) attributes {dimension_semantics = [#tpu.dimension_semantics<parallel>], iteration_bounds = array<i64: 2>, scalar_prefetch = 0 : i64, scratch_operands = 0 : i64, tpu.core_type = #tpu.core_type<tc>, window_params = [{transform_indices = @transform_0, window_bounds = array<i64: 32, 128>}, {pipeline_mode = #tpu.pipeline_mode<synchronous>, transform_indices = @transform_1, window_bounds = array<i64: 3, 384, 128>}, {pipeline_mode = #tpu.pipeline_mode<synchronous>, transform_indices = @transform_2, window_bounds = array<i64: 3, 1, 128>}, {transform_indices = @transform_3, window_bounds = array<i64: 1, 1, 128>}]} {
    %c0 = arith.constant 0 : index
    %c0_0 = arith.constant 0 : index
    %0 = vector.load %arg1[%c0, %c0_0] : memref<32x128xbf16, #tpu.memory_space<vmem>>, vector<32x128xbf16>
    %1 = vector.extract_strided_slice %0 {offsets = [1, 0], sizes = [31, 128], strides = [1, 1]} : vector<32x128xbf16> to vector<31x128xbf16>
    %cst = arith.constant 0.000000e+00 : bf16
    %2 = vector.broadcast %cst : bf16 to vector<1x128xbf16>
    %3 = tpu.concatenate %1, %2 in 0 : vector<31x128xbf16>, vector<1x128xbf16> -> vector<32x128xbf16>
    %4 = vector.extract_strided_slice %0 {offsets = [2, 0], sizes = [30, 128], strides = [1, 1]} : vector<32x128xbf16> to vector<30x128xbf16>
    %cst_1 = arith.constant 0.000000e+00 : bf16
    %5 = vector.broadcast %cst_1 : bf16 to vector<2x128xbf16>
    %6 = tpu.concatenate %4, %5 in 0 : vector<30x128xbf16>, vector<2x128xbf16> -> vector<32x128xbf16>
    %7 = tpu.concatenate %0, %3, %6 in 1 : vector<32x128xbf16>, vector<32x128xbf16>, vector<32x128xbf16> -> vector<32x384xbf16>
    %c0_2 = arith.constant 0 : index
    %c0_3 = arith.constant 0 : index
    %c0_4 = arith.constant 0 : index
    %8 = vector.load %arg2[%c0_2, %c0_3, %c0_4] : memref<3x384x128xbf16, #tpu.memory_space<vmem>>, vector<1x384x128xbf16>
    %9 = vector.shape_cast %8 : vector<1x384x128xbf16> to vector<384x128xbf16>
    %cst_5 = arith.constant dense<0.000000e+00> : vector<32x128xf32>
    %10 = tpu.matmul %7, %9, %cst_5 {dimension_numbers = #tpu.dot_dimension_numbers<[1], [0], [0], [1], [0, 0, 1, 1], [], []>} : vector<32x384xbf16>, vector<384x128xbf16>, vector<32x128xf32> -> vector<32x128xf32>
    %c0_6 = arith.constant 0 : index
    %c0_7 = arith.constant 0 : index
    %c0_8 = arith.constant 0 : index
    %11 = vector.load %arg3[%c0_6, %c0_7, %c0_8] : memref<3x1x128xf32, #tpu.memory_space<vmem>>, vector<1x1x128xf32>
    %12 = vector.shape_cast %11 : vector<1x1x128xf32> to vector<1x128xf32>
    %13 = vector.broadcast %12 : vector<1x128xf32> to vector<32x128xf32>
    %14 = arith.addf %10, %13 : vector<32x128xf32>
    %cst_9 = arith.constant 0.000000e+00 : f32
    %15 = vector.broadcast %cst_9 : f32 to vector<32x128xf32>
    %16 = arith.maximumf %14, %15 : vector<32x128xf32>
    %17 = arith.truncf %16 : vector<32x128xf32> to vector<32x128xbf16>
    %18 = vector.extract_strided_slice %17 {offsets = [1, 0], sizes = [31, 128], strides = [1, 1]} : vector<32x128xbf16> to vector<31x128xbf16>
    %cst_10 = arith.constant 0.000000e+00 : bf16
    %19 = vector.broadcast %cst_10 : bf16 to vector<1x128xbf16>
    %20 = tpu.concatenate %18, %19 in 0 : vector<31x128xbf16>, vector<1x128xbf16> -> vector<32x128xbf16>
    %21 = vector.extract_strided_slice %17 {offsets = [2, 0], sizes = [30, 128], strides = [1, 1]} : vector<32x128xbf16> to vector<30x128xbf16>
    %cst_11 = arith.constant 0.000000e+00 : bf16
    %22 = vector.broadcast %cst_11 : bf16 to vector<2x128xbf16>
    %23 = tpu.concatenate %21, %22 in 0 : vector<30x128xbf16>, vector<2x128xbf16> -> vector<32x128xbf16>
    %24 = tpu.concatenate %17, %20, %23 in 1 : vector<32x128xbf16>, vector<32x128xbf16>, vector<32x128xbf16> -> vector<32x384xbf16>
    %c1 = arith.constant 1 : index
    %c0_12 = arith.constant 0 : index
    %c0_13 = arith.constant 0 : index
    %25 = vector.load %arg2[%c1, %c0_12, %c0_13] : memref<3x384x128xbf16, #tpu.memory_space<vmem>>, vector<1x384x128xbf16>
    %26 = vector.shape_cast %25 : vector<1x384x128xbf16> to vector<384x128xbf16>
    %cst_14 = arith.constant dense<0.000000e+00> : vector<32x128xf32>
    %27 = tpu.matmul %24, %26, %cst_14 {dimension_numbers = #tpu.dot_dimension_numbers<[1], [0], [0], [1], [0, 0, 1, 1], [], []>} : vector<32x384xbf16>, vector<384x128xbf16>, vector<32x128xf32> -> vector<32x128xf32>
    %c1_15 = arith.constant 1 : index
    %c0_16 = arith.constant 0 : index
    %c0_17 = arith.constant 0 : index
    %28 = vector.load %arg3[%c1_15, %c0_16, %c0_17] : memref<3x1x128xf32, #tpu.memory_space<vmem>>, vector<1x1x128xf32>
    %29 = vector.shape_cast %28 : vector<1x1x128xf32> to vector<1x128xf32>
    %30 = vector.broadcast %29 : vector<1x128xf32> to vector<32x128xf32>
    %31 = arith.addf %27, %30 : vector<32x128xf32>
    %cst_18 = arith.constant 0.000000e+00 : f32
    %32 = vector.broadcast %cst_18 : f32 to vector<32x128xf32>
    %33 = arith.maximumf %31, %32 : vector<32x128xf32>
    %34 = arith.truncf %33 : vector<32x128xf32> to vector<32x128xbf16>
    %35 = vector.extract_strided_slice %34 {offsets = [1, 0], sizes = [31, 128], strides = [1, 1]} : vector<32x128xbf16> to vector<31x128xbf16>
    %cst_19 = arith.constant 0.000000e+00 : bf16
    %36 = vector.broadcast %cst_19 : bf16 to vector<1x128xbf16>
    %37 = tpu.concatenate %35, %36 in 0 : vector<31x128xbf16>, vector<1x128xbf16> -> vector<32x128xbf16>
    %38 = vector.extract_strided_slice %34 {offsets = [2, 0], sizes = [30, 128], strides = [1, 1]} : vector<32x128xbf16> to vector<30x128xbf16>
    %cst_20 = arith.constant 0.000000e+00 : bf16
    %39 = vector.broadcast %cst_20 : bf16 to vector<2x128xbf16>
    %40 = tpu.concatenate %38, %39 in 0 : vector<30x128xbf16>, vector<2x128xbf16> -> vector<32x128xbf16>
    %41 = tpu.concatenate %34, %37, %40 in 1 : vector<32x128xbf16>, vector<32x128xbf16>, vector<32x128xbf16> -> vector<32x384xbf16>
    %c2 = arith.constant 2 : index
    %c0_21 = arith.constant 0 : index
    %c0_22 = arith.constant 0 : index
    %42 = vector.load %arg2[%c2, %c0_21, %c0_22] : memref<3x384x128xbf16, #tpu.memory_space<vmem>>, vector<1x384x128xbf16>
    %43 = vector.shape_cast %42 : vector<1x384x128xbf16> to vector<384x128xbf16>
    %cst_23 = arith.constant dense<0.000000e+00> : vector<32x128xf32>
    %44 = tpu.matmul %41, %43, %cst_23 {dimension_numbers = #tpu.dot_dimension_numbers<[1], [0], [0], [1], [0, 0, 1, 1], [], []>} : vector<32x384xbf16>, vector<384x128xbf16>, vector<32x128xf32> -> vector<32x128xf32>
    %c2_24 = arith.constant 2 : index
    %c0_25 = arith.constant 0 : index
    %c0_26 = arith.constant 0 : index
    %45 = vector.load %arg3[%c2_24, %c0_25, %c0_26] : memref<3x1x128xf32, #tpu.memory_space<vmem>>, vector<1x1x128xf32>
    %46 = vector.shape_cast %45 : vector<1x1x128xf32> to vector<1x128xf32>
    %47 = vector.broadcast %46 : vector<1x128xf32> to vector<32x128xf32>
    %48 = arith.addf %44, %47 : vector<32x128xf32>
    %cst_27 = arith.constant 0.000000e+00 : f32
    %49 = vector.broadcast %cst_27 : f32 to vector<32x128xf32>
    %50 = arith.maximumf %48, %49 : vector<32x128xf32>
    %51 = vector.shape_cast %50 : vector<32x128xf32> to vector<1x32x128xf32>
    %52 = tpu.iota {dimensions = array<i32: 0>} : vector<32x128xi32>
    %c26_i32 = arith.constant 26 : i32
    %53 = vector.broadcast %c26_i32 : i32 to vector<32x128xi32>
    %54 = arith.cmpi slt, %52, %53 : vector<32x128xi32>
    %55 = vector.shape_cast %54 : vector<32x128xi1> to vector<1x32x128xi1>
    %cst_28 = arith.constant 0xFF800000 : f32
    %56 = vector.broadcast %cst_28 : f32 to vector<1x32x128xf32>
    %57 = arith.select %55, %51, %56 : vector<1x32x128xi1>, vector<1x32x128xf32>
    %cst_29 = arith.constant dense<0xFF800000> : vector<1x128xf32>
    %58 = vector.multi_reduction <maximumf>, %57, %cst_29 [1] : vector<1x32x128xf32> to vector<1x128xf32>
    %59 = vector.shape_cast %58 : vector<1x128xf32> to vector<1x1x128xf32>
    %c0_30 = arith.constant 0 : index
    %c0_31 = arith.constant 0 : index
    %c0_32 = arith.constant 0 : index
    %60 = vector.load %arg4[%c0_30, %c0_31, %c0_32] : memref<1x1x128xf32, #tpu.memory_space<vmem>>, vector<1x1x128xf32>
    tpu.vector_store %arg4[%c0_30, %c0_31, %c0_32], %59 {strides = array<i32>} : memref<1x1x128xf32, #tpu.memory_space<vmem>>, vector<1x1x128xf32>,
    return
  }
  func.func @transform_0(%arg0: i32) -> (i32, i32) {
    %c0_i32 = arith.constant 0 : i32
    %c0_i32_0 = arith.constant 0 : i32
    return %arg0, %c0_i32 : i32, i32
  }
  func.func @transform_1(%arg0: i32) -> (i32, i32, i32) {
    %c0_i32 = arith.constant 0 : i32
    %c0_i32_0 = arith.constant 0 : i32
    %c0_i32_1 = arith.constant 0 : i32
    %c0_i32_2 = arith.constant 0 : i32
    return %c0_i32, %c0_i32_0, %c0_i32_1 : i32, i32, i32
  }
  func.func @transform_2(%arg0: i32) -> (i32, i32, i32) {
    %c0_i32 = arith.constant 0 : i32
    %c0_i32_0 = arith.constant 0 : i32
    %c0_i32_1 = arith.constant 0 : i32
    %c0_i32_2 = arith.constant 0 : i32
    return %c0_i32, %c0_i32_0, %c0_i32_1 : i32, i32, i32
  }
  func.func @transform_3(%arg0: i32) -> (i32, i32, i32) {
    %c0_i32 = arith.constant 0 : i32
    %c0_i32_0 = arith.constant 0 : i32
    %c0_i32_1 = arith.constant 0 : i32
    return %arg0, %c0_i32, %c0_i32_0 : i32, i32, i32
  }
}

</mosaic_0001>

<bundles_post_ra>
// kernel: apply_fn.1
= control target key start
LH: loop header
LB: loop body
LE: loop exit
PB: predicated region body
PF: predicated region fallthrough
CT: control target
= control target key end

     0   :  { %8 = vsyncpa [#allocation3], 0  ;;  %s1978_s0 = inlined_call_operand.vmem [shape: bf16[64,128], index: 0, kind: input, shape index: {}]   ;;  %s1979_s1 = inlined_call_operand.hbm [shape: bf16[3,384,128], index: 1, kind: input, shape index: {}]   ;;  %s1980_s2 = inlined_call_operand.vmem [shape: f32[3,1,128], index: 2, kind: input, shape index: {}]   ;;  %s1981_s3 = inlined_call_operand.hbm [shape: f32[2,1,128], index: 3, kind: output, shape index: {}]  }
   0x1   :  { %9 = vsyncpa [#allocation4], 0 }
   0x2   :  { %11 = vsyncpa [#allocation4 + $0x1], 0  ;;  %s1814_s12 = smov 0   ;;  %s1816_s13 = smov 0  }
   0x3   :  { %s1818_s14 = smov 0   ;;  %s1820_s15 = smov 0  }
   0x4 LB: > { %s1835_s16 = sadd.s32 4294967295, %s1788_s15   ;;  %s1301_s17 = sadd.s32 4294967294, %s1788_s15   ;;  %s1788_s15 = sphi %s1820_s15, %s1999_s15   ;;  %s1784_s14 = sphi %s1818_s14, %s1998_s14   ;;  %s1780_s13 = sphi %s1816_s13, %s1997_s13   ;;  %s1776_s12 = sphi %s1814_s12, %s1996_s12  }
   0x5   : > { %s1839_s18 = sadd.s32 1, %s1788_s15   ;;  %s92_s19 = sadd.s32 1, %s1784_s14 }
   0x6   : > { %s89_s20 = ssub.s32 %s1788_s15, %s1839_s18  ;;  %p102_p0 = scmp.ne.s32.totalorder %s1784_s14, %s1780_s13 }
   0x7   : > { %p90_p1 = scmp.eq.s32.totalorder %s89_s20, 0  ;;  %p103_p2 = scmp.eq.s32.totalorder %s1835_s16, 1 }
   0x8   : > { %p108_p3 = scmp.ne.s32.totalorder %s1780_s13, %s1776_s12  ;;  %p109_p4 = scmp.eq.s32.totalorder %s1301_s17, 1 }
   0x9   : > { %s1850_s21 = scalar_select %p90_p1, %s1784_s14, %s92_s19  }
   0xa   : > { %p1852_p5 = por %p103_p2, %p102_p0  ;;  %p1856_p6 = por %p109_p4, %p108_p3 }
   0xb   : > { %p1302_p7 = scmp.ge.s32.totalorder %s1788_s15, 1  ;;  %p116_p8 = scmp.lt.s32.totalorder %s1788_s15, 3 }
   0xc   : > { %s1985_s22 = scalar_select %p1852_p5, 1, 0 }
   0xd   : > { %s1986_s23 = scalar_select %p1856_p6, 1, 0 }
   0xe   : > { %p1982_p9 = scmp.eq.s32.totalorder %s1835_s16, 0  ;;  %p1863_p10 = pnand %p1302_p7, %p116_p8 }
   0xf   : > { %s1790_s25 = smov [#allocation2]   ;;  %s1694_s30 = scalar_lea.hbm %s1979_s1, 9216 }
  0x10   : > { %s1987_s24 = scalar_select %p1863_p10, 1, 0 }
  0x11   : > { %s128_s26 = sshll.u32 %s1790_s25, 4  ;;  %p1574_p11 = pneg %p1863_p10  ;;  %s129_s26 = int_to_ptr.vmem [resolvable:$true] %s128_s26 }
  0x12   : > { %p1695_p13 = scmp.ne.s32.totalorder %s1979_s1, %s1694_s30  ;;  %p1701_p3 = scmp.lt.u32.totalorder %s1694_s30, %s1979_s1 }
  0x13   : > { %p1871_p12 = pnand %p1982_p9, %p1574_p11 }
  0x15   : > { %p1696_p0 = pneg %p1871_p12 }
  0x17   : > { %p1697_p1 = pnand %p1696_p0, %p1695_p13 }
  0x19   : > { %p1698_p2 = pneg %p1697_p1 }
  0x1b   : > { %p1703_p4 = pnand %p1701_p3, %p1698_p2 }
  0x1d   : > { %1706 = shalt.err (!%p1703_p4)
}
  0x1e   : > { %s1707_s8 = scalar_lea.vmem %s129_s26, 9216  ;;  %p1715_p9 = scmp.lt.s32.totalorder %s129_s26, %s129_s26 }
  0x1f   : > { %p1708_p7 = scmp.ne.s32.totalorder %s129_s26, %s1707_s8  ;;  %p1716_p6 = scmp.lt.s32.totalorder %s1707_s8, %s1707_s8 }
  0x21   : > { %p1710_p8 = pnand %p1708_p7, %p1696_p0  ;;  %p1717_p5 = por %p1716_p6, %p1715_p9 }
  0x23   : > { %p1711_p11 = pneg %p1710_p8 }
  0x25   : > { %p1718_p10 = pnand %p1717_p5, %p1711_p11 }
  0x27   : > { %1721 = shalt.err (!%p1718_p10)
}
  0x28   : > { %s1791_s9 = smov 64   ;;  %s1792_s10 = smov 4  }
  0x29   : > { %1577 = dma.hbm_to_vmem [thread:$0]  (!%p1871_p12), %s1979_s1, 9216, %s129_s26, [#allocation3], %s1791_s9, %s1791_s9, %s1792_s10  }
  0x2a   : > { %p1989_p13 = scmp.ne.s32.totalorder %s1987_s24, 0 }
  0x2b   : > { %p1990_p1 = scmp.eq.s32.totalorder (!%p1989_p13), %s1835_s16, 0 }
  0x2c   : > { %156 = sbr.rel (%p1989_p13) target bundleno = 825 (0x339), region = 32 }
  0x33   : > { %1767 = dma.done.wait (%p1990_p1), [#allocation3], 9216   ;;  %p1991_p0 = pmov %p1990_p1 }
  0x34   : > { %v1620_v0 = vld [vmem:[#allocation2 + $0x40] sm:$0xff]   ;;  %v1622_v2 = vld [vmem:[#allocation2 + $0x48] sm:$0xff]   ;;  %v1625_v5 = vld [vmem:[#allocation2 + $0x50] sm:$0xff]   ;;  %s1307_s19 = sshll.u32 %s1835_s16, 2  ;;  %vm200_vm0 = vsmask.f32 7424 }
  0x35   : > { %1769 = vsyncadd (%p1991_p0), [#allocation3], 4294958080  ;;  %v1621_v1 = vld [vmem:[#allocation2] sm:$0xff]   ;;  %1394 = vmatprep.subr.bf16.mxu0 %v1620_v0  ;;  %v1624_v4 = vld [vmem:[#allocation2 + $0x8] sm:$0xff]   ;;  %p180_p5 = scmp.lt.s32.totalorder %s1307_s19, 7  ;;  %vm221_vm1 = vcmask 1046528  }
  0x36   : > { %1395 = vmatpush3.bf16.msra.mxu0 %v1621_v1  ;;  %v1623_v3 = vld [vmem:[#allocation2 + $0x80] sm:$0xff]   ;;  %v1626_v6 = vld [vmem:[#allocation2 + $0x88] sm:$0xff]   ;;  %v1627_v7 = vld [vmem:[#allocation2 + $0x10] sm:$0xff]   ;;  %vm218_vm2 = vcmask 1047552   ;;  %s177_s6 = sand.u32 1, %s1780_s13   ;;  %s1391_s7 = sshll.u32 %s1835_s16, 4 }
  0x37   : > { %1396 = vmatprep.subr.bf16.mxu0 %v1622_v2  ;;  %1508 = vmatprep.subr.bf16.mxu1 %v1623_v3  ;;  %v1628_v8 = vld [vmem:[#allocation2 + $0x58] sm:$0xff]   ;;  %v1629_v9 = vld [vmem:[#allocation2 + $0x90] sm:$0xff]   ;;  %v1631_v11 = vld [vmem:[#allocation2 + $0x60] sm:$0xff]   ;;  %s2001_s19 = smov (!%p180_p5, %s1307_s19), 7  ;;  %s178_s8 = scalar_lea.vmem [#allocation5], %s177_s6 }
  0x38   : > { %1509 = vmatpush3.bf16.msra.mxu1 %v1623_v3  ;;  %v1630_v10 = vld [vmem:[#allocation2 + $0x18] sm:$0xff]   ;;  %v1633_v13 = vld [vmem:[#allocation2 + $0x20] sm:$0xff]   ;;  %v1634_v15 = vld [vmem:[#allocation2 + $0x68] sm:$0xff]   ;;  %s1308_s20 = sshll.u32 %s2001_s19, 2  ;;  %s1234_s9 = sshll.u32 %s178_s8, 4  ;;  %s1938_s9 = int_to_ptr.vmem [resolvable:$true] %s1234_s9 }
  0x39   : > { %1510 = vmatprep.subr.bf16.mxu1 %v1626_v6  ;;  %v1632_v12 = vld [vmem:[#allocation2 + $0x98] sm:$0xff]   ;;  %v1635_v14 = vld [vmem:[#allocation2 + $0xa0] sm:$0xff]   ;;  %v1636_v16 = vld [vmem:[#allocation2 + $0x28] sm:$0xff]   ;;  %s183_s26 = scalar_lea.vmem %s1978_s0, %s1308_s20  ;;  %s1936_s17 = scalar_lea.hbm %s1981_s3, %s1391_s7 }
  0x3a   : > { %1397 = vmatpush3.bf16.msra.mxu0 %v1624_v4  ;;  %v1638_v17 = vld [vmem:[#allocation2 + $0xa8] sm:$0xff]   ;;  %v1637_v18 = vld [vmem:[#allocation2 + $0x70] sm:$0xff]   ;;  %v1640_v20 = vld [vmem:[#allocation2 + $0x78] sm:$0xff]   ;;  %s1222_s19 = scalar_lea.sflag [#allocation4], %s177_s6  ;;  %s1722_s20 = scalar_lea.vmem %s1938_s9, 16 }
  0x3b   : > { %1398 = vmatprep.subr.bf16.mxu0 %v1625_v5  ;;  %v1639_v19 = vld [vmem:[#allocation2 + $0x30] sm:$0xff]   ;;  %v1643_v22 = vld [vmem:[%s183_s26] sm:$0xff]   ;;  %v1644_v23 = vld [vmem:[%s183_s26 + $0x8] sm:$0xff]   ;;  %p1723_p6 = scmp.ne.s32.totalorder %s1938_s9, %s1722_s20  ;;  %p1994_p9 = scmp.ne.s32.totalorder %s1985_s22, 0 }
  0x3c   : > { %1511 = vmatpush3.bf16.msra.mxu1 %v1626_v6  ;;  %v1641_v21 = vld [vmem:[#allocation2 + $0xb0] sm:$0xff]   ;;  %v1642_v24 = vld [vmem:[#allocation2 + $0x38] sm:$0xff]   ;;  %v202_v25 = vshrl.u32 %v1643_v22, 16  ;;  %v204_v26 = vshll.u32 %v1643_v22, 16  ;;  %v209_v27 = vshll.u32 %v1644_v23, 16  ;;  %v222_v28 = vrot.slane %v1643_v22, 1  ;;  %vm1904_vm3 = vmand %vm218_vm2, %vm200_vm0 }
  0x3d   : > { %1512 = vmatprep.subr.bf16.mxu1 %v1629_v9  ;;  %v1645_v29 = vld [vmem:[#allocation2 + $0xb8] sm:$0xff]   ;;  %v223_v30 = vrot.slane %v1644_v23, 1  ;;  %v213_v31 = vshrl.u32 %v1644_v23, 16  ;;  %v1647_v32 = vld [vmem:[#allocation2 + $0x100] sm:$0xff]   ;;  %v1649_v43 = vld [vmem:[#allocation2 + $0x148] sm:$0xff]   ;;  %p1724_p10 = pnand %p1723_p6, %p1994_p9  ;;  %s1793_s16 = smov [#allocation5]  }
  0x3e   : > { %1399 = vmatpush3.bf16.msra.mxu0 %v1627_v7  ;;  %v206_v33 = vrot.slane %v204_v26, 1  ;;  %v211_v34 = vrot.slane %v209_v27, 1  ;;  %v1646_v39 = vld [vmem:[#allocation2 + $0x140] sm:$0xff]   ;;  %v1650_v44 = vld [vmem:[#allocation2 + $0x108] sm:$0xff]   ;;  %v1652_v46 = vld [vmem:[#allocation2 + $0x150] sm:$0xff]   ;;  %s1726_s24 = sshll.u32 %s1793_s16, 4  ;;  %s1727_s24 = int_to_ptr.vmem [resolvable:$false] %s1726_s24 }
  0x3f   : > { %1400 = vmatprep.subr.bf16.mxu0 %v1628_v8  ;;  %v224_v35 = vsel %vm221_vm1, %v222_v28, %v223_v30  ;;  %v1648_v42 = vld [vmem:[#allocation2 + $0xc0] sm:$0xff]   ;;  %v1651_v45 = vld [vmem:[#allocation2 + $0xc8] sm:$0xff]   ;;  %v1653_v47 = vld [vmem:[#allocation2 + $0x110] sm:$0xff]   ;;  %p1725_p12 = pneg %p1724_p10  ;;  %s1728_s25 = scalar_lea.vmem %s1727_s24, 32 }
  0x40   : > { %1513 = vmatpush3.bf16.msra.mxu1 %v1629_v9  ;;  %v207_v37 = vor.u32 %v206_v33, %v202_v25  ;;  %1524 = vmatprep.mubr.bf16.mxu1 %v224_v35  ;;  %v215_v38 = vor.u32 %v213_v31, %v211_v34  ;;  %v1654_v48 = vld [vmem:[#allocation2 + $0xd0] sm:$0xff]   ;;  %v1655_v49 = vld [vmem:[#allocation2 + $0x158] sm:$0xff]   ;;  %v1658_v52 = vld [vmem:[#allocation2 + $0x160] sm:$0xff]   ;;  %p1729_p2 = scmp.lt.s32.totalorder %s1938_s9, %s1727_s24  ;;  %p1730_p3 = scmp.lt.s32.totalorder %s1728_s25, %s1722_s20 }
  0x41   : > { %1514 = vmatprep.subr.bf16.mxu1 %v1632_v12  ;;  %v1656_v50 = vld [vmem:[#allocation2 + $0x118] sm:$0xff]   ;;  %v1659_v53 = vld [vmem:[#allocation2 + $0x120] sm:$0xff]   ;;  %v1661_v55 = vld [vmem:[#allocation2 + $0x168] sm:$0xff]  }
  0x42   : > { %1401 = vmatpush3.bf16.msra.mxu0 %v1630_v10  ;;  %v212_v40 = vsel %vm200_vm0, %v207_v37, %v211_v34  ;;  %v220_v41 = vsel %vm1904_vm3, %v215_v38, 0  ;;  %v1657_v51 = vld [vmem:[#allocation2 + $0xd8] sm:$0xff]   ;;  %v1660_v54 = vld [vmem:[#allocation2 + $0xe0] sm:$0xff]   ;;  %v1662_v56 = vld [vmem:[#allocation2 + $0x128] sm:$0xff]   ;;  %p1731_p4 = por %p1730_p3, %p1729_p2 }
  0x43   : > { %1402 = vmatprep.subr.bf16.mxu0 %v1631_v11  ;;  %464 = vmatprep.mubr.bf16.mxu0 %v212_v40  ;;  %v1663_v57 = vld [vmem:[#allocation2 + $0xe8] sm:$0xff]   ;;  %v1664_v58 = vld [vmem:[#allocation2 + $0x170] sm:$0xff]   ;;  %v1667_v61 = vld [vmem:[#allocation2 + $0x178] sm:$0xff]  }
  0x44   : > { %1515 = vmatpush3.bf16.msra.mxu1 %v1632_v12  ;;  %v1665_v59 = vld [vmem:[#allocation2 + $0x130] sm:$0xff]   ;;  %v1668_v62 = vld [vmem:[#allocation2 + $0x138] sm:$0xff]   ;;  %v1670_v0 = vld [vmem:[#allocation2 + $0x200] sm:$0xff]   ;;  %p1732_p7 = pnand %p1731_p4, %p1725_p12 }
  0x45   : > { %1516 = vmatprep.subr.bf16.mxu1 %v1635_v14  ;;  %v1666_v60 = vld [vmem:[#allocation2 + $0xf0] sm:$0xff]   ;;  %v1669_v63 = vld [vmem:[#allocation2 + $0xf8] sm:$0xff]   ;;  %v1671_v1 = vld [vmem:[#allocation2 + $0x1c0] sm:$0xff]  }
  0x46   : > { %1403 = vmatpush3.bf16.msra.mxu0 %v1633_v13  ;;  %v1311_v4 = vld [vmem:[%s1980_s2] ss:$0 sm:$0xff] }
  0x47   : > { %1404 = vmatprep.subr.bf16.mxu0 %v1634_v15 }
  0x48   : > { %1517 = vmatpush3.bf16.msra.mxu1 %v1635_v14 }
  0x49   : > { %1518 = vmatprep.subr.bf16.mxu1 %v1638_v17 }
  0x4a   : > { %1405 = vmatpush3.bf16.msra.mxu0 %v1636_v16 }
  0x4b   : > { %1406 = vmatprep.subr.bf16.mxu0 %v1637_v18 }
  0x4c   : > { %1519 = vmatpush3.bf16.msra.mxu1 %v1638_v17 }
  0x4d   : > { %1520 = vmatprep.subr.bf16.mxu1 %v1641_v21 }
  0x4e   : > { %1407 = vmatpush3.bf16.msra.mxu0 %v1639_v19 }
  0x4f   : > { %1408 = vmatprep.subr.bf16.mxu0 %v1640_v20 }
  0x50   : > { %1521 = vmatpush3.bf16.msra.mxu1 %v1641_v21 }
  0x51   : > { %1522 = vmatprep.subr.bf16.mxu1 %v1645_v29 }
  0x52   : > { %1409 = vmatpush3.bf16.msra.mxu0 %v1642_v24 }
  0x53   : > { %1432 = vmatprep.subr.bf16.mxu0 %v1647_v32 }
  0x54   : > { %1523 = vmatpush3.bf16.msra.mxu1 %v1645_v29 }
  0x55   : > { %465 = vmatmul.mubr.bf16.vlgmr.msra.gmra.mrb[0].mxu0 %v1643_v22  ;;  %1528 = vmatprep.subr.bf16.mxu1 %v1646_v39 }
  0x56   : > { %472 = vmatprep.mubr.bf16.mxu0 %v220_v41  ;;  %1433 = vmatpush3.bf16.msra.mxu0 %v1648_v42 }
  0x57   : > { %1525 = vmatmul.mubr.msk.bf16.vlgmr.msra.gmra.mrb[0].mxu1 %vm221_vm1, %v223_v30  ;;  %1434 = vmatprep.subr.bf16.mxu0 %v1650_v44  ;;  %v1672_v44 = vld [vmem:[#allocation2 + $0x180] sm:$0xff]  }
  0x58   : > { %1529 = vmatpush3.bf16.msra.mxu1 %v1646_v39 }
  0x59   : > { %1530 = vmatprep.subr.bf16.mxu1 %v1649_v43 }
  0x5a   : > { %1435 = vmatpush3.bf16.msra.mxu0 %v1651_v45 }
  0x5b   : > { %1436 = vmatprep.subr.bf16.mxu0 %v1653_v47 }
  0x5c   : > { %1531 = vmatpush3.bf16.msra.mxu1 %v1649_v43 }
  0x5d   : > { %473 = vmatmul.mubr.bf16.gmra.mrb[4].mxu0 %v1644_v23  ;;  %1532 = vmatprep.subr.bf16.mxu1 %v1652_v46 }
  0x5e   : > { %1437 = vmatpush3.bf16.msra.mxu0 %v1654_v48  ;;  %v1673_v48 = vld [vmem:[#allocation2 + $0x208] sm:$0xff]  }
  0x5f   : > { %1438 = vmatprep.subr.bf16.mxu0 %v1656_v50  ;;  %v1675_v50 = vld [vmem:[#allocation2 + $0x188] sm:$0xff]  }
  0x60   : > { %1533 = vmatpush3.bf16.msra.mxu1 %v1652_v46 }
  0x61   : > { %1534 = vmatprep.subr.bf16.mxu1 %v1655_v49 }
  0x62   : > { %1439 = vmatpush3.bf16.msra.mxu0 %v1657_v51  ;;  %v1676_v51 = vld [vmem:[#allocation2 + $0x210] sm:$0xff]  }
  0x63   : > { %1440 = vmatprep.subr.bf16.mxu0 %v1659_v53  ;;  %v1678_v53 = vld [vmem:[#allocation2 + $0x190] sm:$0xff]  }
  0x64   : > { %1535 = vmatpush3.bf16.msra.mxu1 %v1655_v49  ;;  %v1674_v49 = vld [vmem:[#allocation2 + $0x1c8] sm:$0xff]  }
  0x65   : > { %1536 = vmatprep.subr.bf16.mxu1 %v1658_v52 }
  0x66   : > { %1441 = vmatpush3.bf16.msra.mxu0 %v1660_v54  ;;  %v1679_v54 = vld [vmem:[#allocation2 + $0x218] sm:$0xff]  }
  0x67   : > { %1442 = vmatprep.subr.bf16.mxu0 %v1662_v56  ;;  %v1681_v56 = vld [vmem:[#allocation2 + $0x198] sm:$0xff]  }
  0x68   : > { %1537 = vmatpush3.bf16.msra.mxu1 %v1658_v52  ;;  %v1677_v52 = vld [vmem:[#allocation2 + $0x1d0] sm:$0xff]  }
  0x69   : > { %1538 = vmatprep.subr.bf16.mxu1 %v1661_v55 }
  0x6a   : > { %1443 = vmatpush3.bf16.msra.mxu0 %v1663_v57  ;;  %v1682_v57 = vld [vmem:[#allocation2 + $0x220] sm:$0xff]  }
  0x6b   : > { %1444 = vmatprep.subr.bf16.mxu0 %v1665_v59  ;;  %v1684_v59 = vld [vmem:[#allocation2 + $0x1a0] sm:$0xff]  }
  0x6c   : > { %1539 = vmatpush3.bf16.msra.mxu1 %v1661_v55  ;;  %v1680_v55 = vld [vmem:[#allocation2 + $0x1d8] sm:$0xff]  }
  0x6d   : > { %1540 = vmatprep.subr.bf16.mxu1 %v1664_v58 }
  0x6e   : > { %1445 = vmatpush3.bf16.msra.mxu0 %v1666_v60  ;;  %v1685_v60 = vld [vmem:[#allocation2 + $0x228] sm:$0xff]  }
  0x6f   : > { %1446 = vmatprep.subr.bf16.mxu0 %v1668_v62  ;;  %v1687_v62 = vld [vmem:[#allocation2 + $0x1a8] sm:$0xff]  }
  0x70   : > { %1541 = vmatpush3.bf16.msra.mxu1 %v1664_v58  ;;  %v1683_v58 = vld [vmem:[#allocation2 + $0x1e0] sm:$0xff]  }
  0x71   : > { %1542 = vmatprep.subr.bf16.mxu1 %v1667_v61 }
  0x72   : > { %1447 = vmatpush3.bf16.msra.mxu0 %v1669_v63  ;;  %v1688_v63 = vld [vmem:[#allocation2 + $0x230] sm:$0xff]  }
  0x73   : > { %1470 = vmatprep.subr.bf16.mxu0 %v1671_v1  ;;  %v1690_v1 = vld [vmem:[#allocation2 + $0x1b0] sm:$0xff]  }
  0x74   : > { %1543 = vmatpush3.bf16.msra.mxu1 %v1667_v61  ;;  %v1686_v61 = vld [vmem:[#allocation2 + $0x1e8] sm:$0xff]  }
  0x75   : > { %1548 = vmatprep.subr.bf16.mxu1 %v1670_v0 }
 0x128   : > { %v1410_v2 = vpop.f32.mrb[0].mxu0 }
 0x129   : > { %v1411_v3 = vpop.f32.mrb[1].mxu0 }
 0x12a   : > { %v1412_v5 = vadd.f32 %v1411_v3, %v1410_v2  ;;  %v1413_v6 = vpop.f32.mrb[2].mxu0  ;;  %v1526_v8 = vpop.f32.mrb[0].mxu1  ;;  %v1691_v2 = vld [vmem:[#allocation2 + $0x238] sm:$0xff]  }
 0x12b   : > { %v1414_v7 = vpop.f32.mrb[3].mxu0  ;;  %v515_v11 = vpop.f32.mrb[1].mxu1  ;;  %v1692_v3 = vld [vmem:[#allocation2 + $0x1f8] sm:$0xff]  }
 0x12c   : > { %v1415_v9 = vadd.f32 %v1414_v7, %v1413_v6  ;;  %v467_v10 = vadd.f32 %v1412_v5, %v1311_v4  ;;  %v1527_v12 = vpop.f32.mrb[2].mxu1 }
 0x12d   : > { %v518_v15 = vpop.f32.mrb[3].mxu1 }
 0x12e   : > { %v516_v13 = vadd.f32 %v515_v11, %v467_v10  ;;  %v470_v14 = vadd.f32 %v1415_v9, %v1311_v4  ;;  %v1338_v9 = vld [vmem:[%s1980_s2 + $0x1] ss:$0 sm:$0xff] }
 0x130   : > { %v519_v16 = vadd.f32 %v518_v15, %v470_v14  ;;  %v1416_v17 = vpop.f32.mrb[4].mxu0  ;;  %v530_v19 = vmax.f32 %v516_v13, 0.0 }
 0x131   : > { %v1417_v18 = vpop.f32.mrb[5].mxu0 }
 0x132   : > { %v531_v20 = vmax.f32 %v519_v16, 0.0  ;;  %v1418_v21 = vadd.f32 %v1417_v18, %v1416_v17  ;;  %v1419_v22 = vpop.f32.mrb[6].mxu0 }
 0x133   : > { %v1420_v23 = vpop.f32.mrb[7].mxu0 }
 0x134   : > { %v534_v24 = vpack.c.bf16 %v531_v20, %v530_v19  ;;  %v475_v25 = vadd.f32 %v1418_v21, %v1311_v4  ;;  %v1421_v26 = vadd.f32 %v1420_v23, %v1419_v22 }
 0x136   : > { %v524_v27 = vadd.f32 %v1526_v8, %v475_v25  ;;  %v478_v28 = vadd.f32 %v1421_v26, %v1311_v4  ;;  %v539_v30 = vshll.u32 %v534_v24, 16  ;;  %v556_v35 = vrot.slane %v534_v24, 1  ;;  %v1693_v4 = vld [vmem:[#allocation2 + $0x1b8] sm:$0xff]  }
 0x137   : > { %v537_v38 = vshrl.u32 %v534_v24, 16 }
 0x138   : > { %v527_v29 = vadd.f32 %v1527_v12, %v478_v28  ;;  %v532_v31 = vmax.f32 %v524_v27, 0.0  ;;  %v541_v34 = vrot.slane %v539_v30, 1 }
 0x13a   : > { %v533_v32 = vmax.f32 %v527_v29, 0.0  ;;  %v542_v41 = vor.u32 %v541_v34, %v537_v38 }
 0x13c   : > { %v535_v33 = vpack.c.bf16 %v533_v32, %v532_v31 }
 0x13e   : > { %v557_v37 = vrot.slane %v535_v33, 1  ;;  %v544_v39 = vshll.u32 %v535_v33, 16  ;;  %v548_v43 = vshrl.u32 %v535_v33, 16 }
 0x140   : > { %v558_v40 = vsel %vm221_vm1, %v556_v35, %v557_v37  ;;  %v546_v42 = vrot.slane %v544_v39, 1 }
 0x141   : > { %1544 = vmatprep.mubr.bf16.mxu1 %v558_v40 }
 0x142   : > { %1545 = vmatmul.mubr.msk.bf16.vlgmr.msra.gmra.mrb[4].mxu1 %vm221_vm1, %v557_v37  ;;  %v547_v45 = vsel %vm200_vm0, %v542_v41, %v546_v42  ;;  %v550_v46 = vor.u32 %v548_v43, %v546_v42 }
 0x143   : > { %796 = vmatprep.mubr.bf16.mxu0 %v547_v45  ;;  %1549 = vmatpush3.bf16.msra.mxu1 %v1670_v0  ;;  %v1689_v0 = vld [vmem:[#allocation2 + $0x1f0] sm:$0xff]  }
 0x144   : > { %797 = vmatmul.mubr.bf16.vlgmr.msra.gmra.mrb[8].mxu0 %v534_v24  ;;  %v553_v47 = vsel %vm1904_vm3, %v550_v46, 0  ;;  %1550 = vmatprep.subr.bf16.mxu1 %v1673_v48 }
 0x145   : > { %804 = vmatprep.mubr.bf16.mxu0 %v553_v47  ;;  %1471 = vmatpush3.bf16.msra.mxu0 %v1672_v44 }
 0x146   : > { %1472 = vmatprep.subr.bf16.mxu0 %v1674_v49 }
 0x147   : > { %1551 = vmatpush3.bf16.msra.mxu1 %v1673_v48 }
 0x148   : > { %1552 = vmatprep.subr.bf16.mxu1 %v1676_v51 }
 0x149   : > { %1473 = vmatpush3.bf16.msra.mxu0 %v1675_v50 }
 0x14a   : > { %1474 = vmatprep.subr.bf16.mxu0 %v1677_v52 }
 0x14b   : > { %1553 = vmatpush3.bf16.msra.mxu1 %v1676_v51 }
 0x14c   : > { %805 = vmatmul.mubr.bf16.gmra.mrb[12].mxu0 %v535_v33  ;;  %1554 = vmatprep.subr.bf16.mxu1 %v1679_v54 }
 0x14d   : > { %1475 = vmatpush3.bf16.msra.mxu0 %v1678_v53 }
 0x14e   : > { %1476 = vmatprep.subr.bf16.mxu0 %v1680_v55 }
 0x14f   : > { %1555 = vmatpush3.bf16.msra.mxu1 %v1679_v54  ;;  %v1365_v54 = vld [vmem:[%s1980_s2 + $0x2] ss:$0 sm:$0xff] }
 0x150   : > { %1556 = vmatprep.subr.bf16.mxu1 %v1682_v57 }
 0x151   : > { %1477 = vmatpush3.bf16.msra.mxu0 %v1681_v56 }
 0x152   : > { %1478 = vmatprep.subr.bf16.mxu0 %v1683_v58 }
 0x153   : > { %1557 = vmatpush3.bf16.msra.mxu1 %v1682_v57 }
 0x154   : > { %1558 = vmatprep.subr.bf16.mxu1 %v1685_v60 }
 0x155   : > { %1479 = vmatpush3.bf16.msra.mxu0 %v1684_v59 }
 0x156   : > { %1480 = vmatprep.subr.bf16.mxu0 %v1686_v61 }
 0x157   : > { %1559 = vmatpush3.bf16.msra.mxu1 %v1685_v60 }
 0x158   : > { %1560 = vmatprep.subr.bf16.mxu1 %v1688_v63 }
 0x159   : > { %1481 = vmatpush3.bf16.msra.mxu0 %v1687_v62  ;;  %v1198_v62 = vlaneseq }
 0x15a   : > { %1482 = vmatprep.subr.bf16.mxu0 %v1689_v0 }
 0x15b   : > { %1561 = vmatpush3.bf16.msra.mxu1 %v1688_v63 }
 0x15c   : > { %1562 = vmatprep.subr.bf16.mxu1 %v1691_v2 }
 0x15d   : > { %1483 = vmatpush3.bf16.msra.mxu0 %v1690_v1 }
 0x15e   : > { %1484 = vmatprep.subr.bf16.mxu0 %v1692_v3  ;;  %v1199_v3 = vshrl.u32 %v1198_v62, 7 }
 0x15f   : > { %1563 = vmatpush3.bf16.msra.mxu1 %v1691_v2 }
 0x161   : > { %1485 = vmatpush3.bf16.msra.mxu0 %v1693_v4 }
 0x215   : > { %v1546_v5 = vpop.f32.mrb[4].mxu1 }
 0x216   : > { %v847_v6 = vpop.f32.mrb[5].mxu1 }
 0x217   : > { %v1448_v7 = vpop.f32.mrb[8].mxu0  ;;  %v1547_v8 = vpop.f32.mrb[6].mxu1 }
 0x218   : > { %v1449_v10 = vpop.f32.mrb[9].mxu0  ;;  %v850_v11 = vpop.f32.mrb[7].mxu1 }
 0x219   : > { %v1450_v12 = vadd.f32 %v1449_v10, %v1448_v7  ;;  %v1451_v13 = vpop.f32.mrb[10].mxu0 }
 0x21a   : > { %v1452_v14 = vpop.f32.mrb[11].mxu0 }
 0x21b   : > { %v799_v15 = vadd.f32 %v1450_v12, %v1338_v9  ;;  %v1453_v16 = vadd.f32 %v1452_v14, %v1451_v13  ;;  %v1202_v12 = vadd.s32 24, %v1199_v3 }
 0x21d   : > { %v848_v17 = vadd.f32 %v847_v6, %v799_v15  ;;  %v802_v18 = vadd.f32 %v1453_v16, %v1338_v9  ;;  %vm1206_vm4 = vcmp.lt.s32.totalorder %v1202_v12, 26 }
 0x21f   : > { %v851_v19 = vadd.f32 %v850_v11, %v802_v18  ;;  %v1454_v20 = vpop.f32.mrb[12].mxu0  ;;  %v862_v22 = vmax.f32 %v848_v17, 0.0 }
 0x220   : > { %v1455_v21 = vpop.f32.mrb[13].mxu0 }
 0x221   : > { %v863_v23 = vmax.f32 %v851_v19, 0.0  ;;  %v1456_v24 = vadd.f32 %v1455_v21, %v1454_v20  ;;  %v1457_v25 = vpop.f32.mrb[14].mxu0 }
 0x222   : > { %v1458_v26 = vpop.f32.mrb[15].mxu0 }
 0x223   : > { %v866_v27 = vpack.c.bf16 %v863_v23, %v862_v22  ;;  %v807_v28 = vadd.f32 %v1456_v24, %v1338_v9  ;;  %v1459_v29 = vadd.f32 %v1458_v26, %v1457_v25 }
 0x225   : > { %v856_v30 = vadd.f32 %v1546_v5, %v807_v28  ;;  %v810_v31 = vadd.f32 %v1459_v29, %v1338_v9  ;;  %v871_v33 = vshll.u32 %v866_v27, 16  ;;  %v888_v39 = vrot.slane %v866_v27, 1 }
 0x226   : > { %v869_v41 = vshrl.u32 %v866_v27, 16 }
 0x227   : > { %v859_v32 = vadd.f32 %v1547_v8, %v810_v31  ;;  %v864_v34 = vmax.f32 %v856_v30, 0.0  ;;  %v873_v38 = vrot.slane %v871_v33, 1 }
 0x229   : > { %v865_v35 = vmax.f32 %v859_v32, 0.0  ;;  %v874_v44 = vor.u32 %v873_v38, %v869_v41 }
 0x22b   : > { %v867_v37 = vpack.c.bf16 %v865_v35, %v864_v34 }
 0x22d   : > { %v889_v40 = vrot.slane %v867_v37, 1  ;;  %v876_v42 = vshll.u32 %v867_v37, 16  ;;  %v880_v46 = vshrl.u32 %v867_v37, 16 }
 0x22f   : > { %v890_v43 = vsel %vm221_vm1, %v888_v39, %v889_v40  ;;  %v878_v45 = vrot.slane %v876_v42, 1 }
 0x230   : > { %1564 = vmatprep.mubr.bf16.mxu1 %v890_v43 }
 0x231   : > { %1565 = vmatmul.mubr.msk.bf16.vlgmr.msra.gmra.mrb[8].mxu1 %vm221_vm1, %v889_v40  ;;  %v879_v47 = vsel %vm200_vm0, %v874_v44, %v878_v45  ;;  %v882_v48 = vor.u32 %v880_v46, %v878_v45 }
 0x232   : > { %1128 = vmatprep.mubr.bf16.mxu0 %v879_v47 }
 0x233   : > { %1129 = vmatmul.mubr.bf16.vlgmr.msra.gmra.mrb[16].mxu0 %v866_v27  ;;  %v885_v49 = vsel %vm1904_vm3, %v882_v48, 0 }
 0x234   : > { %1136 = vmatprep.mubr.bf16.mxu0 %v885_v49 }
 0x23b   : > { %1137 = vmatmul.mubr.bf16.gmra.mrb[20].mxu0 %v867_v37 }
 0x304   : > { %v1566_v50 = vpop.f32.mrb[8].mxu1 }
 0x305   : > { %v1179_v51 = vpop.f32.mrb[9].mxu1 }
 0x306   : > { %v1486_v52 = vpop.f32.mrb[16].mxu0  ;;  %v1567_v53 = vpop.f32.mrb[10].mxu1 }
 0x307   : > { %v1487_v55 = vpop.f32.mrb[17].mxu0  ;;  %v1182_v56 = vpop.f32.mrb[11].mxu1 }
 0x308   : > { %v1488_v57 = vadd.f32 %v1487_v55, %v1486_v52  ;;  %v1489_v58 = vpop.f32.mrb[18].mxu0 }
 0x309   : > { %v1490_v59 = vpop.f32.mrb[19].mxu0 }
 0x30a   : > { %v1131_v60 = vadd.f32 %v1488_v57, %v1365_v54  ;;  %v1491_v61 = vadd.f32 %v1490_v59, %v1489_v58 }
 0x30c   : > { %v1180_v36 = vadd.f32 %v1179_v51, %v1131_v60  ;;  %v1134_v63 = vadd.f32 %v1491_v61, %v1365_v54 }
 0x30e   : > { %v1183_v0 = vadd.f32 %v1182_v56, %v1134_v63  ;;  %v1492_v1 = vpop.f32.mrb[20].mxu0  ;;  %v1194_v4 = vmax.f32 %v1180_v36, 0.0 }
 0x30f   : > { %v1493_v2 = vpop.f32.mrb[21].mxu0 }
 0x310   : > { %v1195_v5 = vmax.f32 %v1183_v0, 0.0  ;;  %v1494_v6 = vadd.f32 %v1493_v2, %v1492_v1  ;;  %v1495_v7 = vpop.f32.mrb[22].mxu0 }
 0x311   : > { %v1496_v8 = vpop.f32.mrb[23].mxu0 }
 0x312   : > { %v1211_v9 = vmax.f32 %v1194_v4, %v1195_v5  ;;  %v1139_v10 = vadd.f32 %v1494_v6, %v1365_v54  ;;  %v1497_v11 = vadd.f32 %v1496_v8, %v1495_v7 }
 0x314   : > { %v1188_v13 = vadd.f32 %v1566_v50, %v1139_v10  ;;  %v1142_v14 = vadd.f32 %v1497_v11, %v1365_v54 }
 0x316   : > { %v1191_v15 = vadd.f32 %v1567_v53, %v1142_v14  ;;  %v1196_v17 = vmax.f32 %v1188_v13, 0.0 }
 0x318   : > { %v1197_v16 = vmax.f32 %v1191_v15, 0.0 }
 0x31a   : > { %v1210_v18 = vsel %vm1206_vm4, %v1197_v16, -inf }
 0x31b   : > { %v1212_v19 = vmax.f32 %v1196_v17, %v1210_v18 }
 0x31d   : > { %v1213_v20 = vmax.f32 %v1211_v9, %v1212_v19 }
 0x31f   : > { %v1214_v21 = vrot.slane %v1213_v20, 4 }
 0x321   : > { %v1215_v22 = vmax.f32 %v1213_v20, %v1214_v21 }
 0x323   : > { %v1216_v23 = vrot.slane %v1215_v22, 2 }
 0x325   : > { %v1217_v24 = vmax.f32 %v1215_v22, %v1216_v23 }
 0x327   : > { %v1218_v25 = vrot.slane %v1217_v24, 1 }
 0x329   : > { %v1219_v26 = vmax.f32 %v1217_v24, %v1218_v25 }
 0x32b   : > { %1220 = vst [vmem:[%s178_s8] sm:$0x1] %v1219_v26 }
 0x32c   : > { %1735 = shalt.err (!%p1732_p7)
}
 0x32d   : > { %s1736_s26 = scalar_lea.hbm %s1936_s17, 16  ;;  %s1740_s29 = scalar_lea.hbm %s1981_s3, 32 }
 0x32e   : > { %p1737_p8 = scmp.ne.s32.totalorder %s1936_s17, %s1736_s26  ;;  %p1741_p1 = scmp.lt.u32.totalorder %s1936_s17, %s1981_s3 }
 0x32f   : > { %p1742_p0 = scmp.lt.u32.totalorder %s1740_s29, %s1736_s26  ;;  %p1744_p6 = scmp.lt.u32.totalorder %s1736_s26, %s1936_s17 }
 0x330   : > { %p1738_p11 = pnand %p1737_p8, %p1994_p9 }
 0x331   : > { %p1743_p5 = por %p1742_p0, %p1741_p1 }
 0x332   : > { %p1739_p13 = pneg %p1738_p11 }
 0x333   : > { %p1745_p10 = por %p1744_p6, %p1743_p5 }
 0x335   : > { %p1746_p12 = pnand %p1745_p10, %p1739_p13 }
 0x337   : > { %1749 = shalt.err (!%p1746_p12)
}
 0x338   : > { %1572 = dma.vmem_to_hbm [thread:$0]  (%p1994_p9), %s1938_s9, 16, %s1936_s17, %s1222_s19  }
 0x339 PF: > { %p1584_p2 = scmp.ge.s32.totalorder %s1788_s15, 2  ;;  %s1246_s5 = sand.u32 1, %s1776_s12  }
 0x33a   : > { %p1995_p3 = scmp.ne.s32.totalorder %s1986_s23, 0  ;;  %s1247_s6 = scalar_lea.sflag [#allocation4], %s1246_s5 }
 0x33c   : > { %p1579_p4 = pnand %p1584_p2, %p1995_p3 }
 0x33e   : > { %1771 = dma.done.wait (!%p1579_p4), %s1247_s6, 16  }
 0x33f   : > { %1773 = vsyncadd (!%p1579_p4), %s1247_s6, 4294967280  ;;  %p14_p7 = scmp.ge.s32.totalorder %s1839_s18, 4   ;;  %s1996_s12 = smov %s1780_s13 }
 0x340   : > { %s1997_s13 = smov %s1784_s14  ;;  %s1998_s14 = smov %s1850_s21 }
 0x341   : > { %s1999_s15 = smov %s1839_s18  ;;  %16 = sbr.rel (!%p14_p7) target bundleno = 4 (0x4), region = 76 }
 0x348   :  { %1251 = vsyncpa [#allocation3], 1 }
 0x349   :  { %1253 = vsyncpa [#allocation3 + $0x1], 1 }
 0x34a   :  { %1254 = vsyncpa [#allocation4], 1 }
 0x34b   :  { %1256 = vsyncpa [#allocation4 + $0x1], 1 }

</bundles_post_ra>
